<compile_context>
chip_gen: v7x
topology: tpu7x:2x2x1
jax: 0.10.0
libtpu: 0.0.40
codegen_flags: <defaults>
</compile_context>

<pallas_src>
import functools

import jax
import jax.numpy as jnp
from jax import lax
from jax.experimental import pallas as pl
from jax.experimental.pallas import tpu as pltpu

K_CURV = 1.0               # Lorentz curvature parameter k
LL_EXP_SCALE = 10.0        # exp(LorentzLinear.scale), scale init = log(10)
ATTN_BIAS = 0.0            # HypCLIPAttention.bias (scalar); uniform constant cancels in softmax


# ------------------------- generation-aware config ---------------------------

@functools.lru_cache(maxsize=None)
def _hw_config():
    """VMEM limit + row-tile size by chip generation (v7x has 64 MiB VMEM/TC)."""
    vmem_cap = 128 * 1024 * 1024
    try:
        vmem_cap = int(getattr(pltpu.get_tpu_info(), "vmem_capacity_bytes", vmem_cap))
    except Exception:
        pass
    if vmem_cap <= 64 * 1024 * 1024:            # v7x-class
        return {"vmem_limit": 48 * 1024 * 1024, "block_rows": 256}
    return {"vmem_limit": 100 * 1024 * 1024, "block_rows": 1024}  # v5e / v6e


def _head_group(num_heads, head_dim):
    """Smallest head bundle whose lane width is a multiple of 128 (or full D)."""
    for g in range(1, num_heads + 1):
        if num_heads % g == 0 and (g * head_dim) % 128 == 0:
            return g
    return num_heads


# ----------------------------- kernels ---------------------------------------

def _fused_qkv_kernel(xt_ref, xs_ref, wts_ref, wss_ref, wtg_ref, wsg_ref,
                      bs_ref, bg_ref, q_ref, k_ref, v_ref, *, d, exp_scale, k_curv):
    """Fused q/k/v LorentzLinear (normalize=True); emits only the space parts
    (the projection's time coordinate is discarded by _shape in the reference)."""
    xt = xt_ref[...]                                        # (R, 1)  f32 time coord
    xs_b = xs_ref[...].astype(jnp.bfloat16)                 # (R, D)  bf16 for the MXU

    # space outputs for q|k|v concatenated: (R, 3D)
    ys = (jnp.dot(xs_b, wss_ref[...], preferred_element_type=jnp.float32)
          + xt * wts_ref[...].astype(jnp.float32) + bs_ref[...])
    # sigmoid time gates for q|k|v: (R, 3)
    yg = (jnp.dot(xs_b, wsg_ref[...], preferred_element_type=jnp.float32)
          + xt * wtg_ref[...].astype(jnp.float32) + bg_ref[...])
    t = jax.nn.sigmoid(yg) * exp_scale + 1.1                # (R, 3)

    for j, o_ref in enumerate((q_ref, k_ref, v_ref)):
        s = ys[:, j * d:(j + 1) * d]                        # (R, D)
        tj = t[:, j:j + 1]                                  # (R, 1)
        sq = jnp.maximum(jnp.sum(s * s, axis=-1, keepdims=True), 1e-8)
        factor = jnp.sqrt(tj * tj - k_curv) * lax.rsqrt(sq)
        o_ref[...] = (s * factor).astype(o_ref.dtype)       # lane-dense bf16 store


def _hyp_attention_kernel(q_ref, k_ref, v_ref, m_ref, o_ref, *,
                          heads_in_block, head_dim, scale, k_curv):
    """One (batch, head-group) step: per-head add_time, Lorentz scores, softmax,
    Lorentz centroid; result written to the group's 128-aligned output block."""
    mask = m_ref[0, 0]                                      # (T, T)  f32 additive mask
    qg = q_ref[0]                                           # (T, g*hd) bf16
    kg = k_ref[0]
    vg = v_ref[0]

    outs = []
    for i in range(heads_in_block):
        sl = slice(i * head_dim, (i + 1) * head_dim)
        qh, kh, vh = qg[:, sl], kg[:, sl], vg[:, sl]        # (T, hd) bf16, static slices
        qf = qh.astype(jnp.float32)
        kf = kh.astype(jnp.float32)
        vf = vh.astype(jnp.float32)
        # per-head add_time (what _shape does in the reference), kept in f32
        qt = jnp.sqrt(k_curv + jnp.sum(qf * qf, axis=-1, keepdims=True))  # (T,1)
        kt = jnp.sqrt(k_curv + jnp.sum(kf * kf, axis=-1, keepdims=True))  # (T,1)
        vt = jnp.sqrt(k_curv + jnp.sum(vf * vf, axis=-1, keepdims=True))  # (T,1)

        # <q,k>_L = -q_t k_t + q_s.k_s : space part on the MXU (bf16, f32 acc),
        # rank-1 time term as an f32 K=1 dot (no bf16 rounding on the time coords).
        s = lax.dot_general(qh, kh, (((1,), (1,)), ((), ())),
                            preferred_element_type=jnp.float32)           # (T, T)
        tt = lax.dot_general(qt, kt, (((1,), (1,)), ((), ())),
                             preferred_element_type=jnp.float32)          # (T, T)
        # reference logits: (2 + 2*<q,k>_L)*scale + bias + mask ; the uniform
        # constant (2*scale + bias) cancels in the softmax, so only the slope stays.
        w = (s - tt) * (2.0 * scale) + mask
        w = w - jnp.max(w, axis=-1, keepdims=True)
        e = jnp.exp(w)
        p = e * pl.reciprocal(jnp.sum(e, axis=-1, keepdims=True), approx=True)

        # Lorentz centroid: space on the MXU (bf16), time column in f32.
        avg_s = jnp.dot(p.astype(jnp.bfloat16), vh,
                        preferred_element_type=jnp.float32)                # (T, hd)
        avg_t = jnp.dot(p, vt, preferred_element_type=jnp.float32)         # (T, 1)
        inner = jnp.sum(avg_s * avg_s, axis=-1, keepdims=True) - avg_t * avg_t
        res = (jnp.sqrt(k_curv) * avg_s) * lax.rsqrt(jnp.maximum(jnp.abs(inner), 1e-8))
        outs.append(res.astype(o_ref.dtype))                # space part only

    o_ref[0] = outs[0] if heads_in_block == 1 else jnp.concatenate(outs, axis=-1)


def _out_proj_residual_kernel(a_ref, xs_ref, wts_ref, wss_ref, wtg_ref, wsg_ref,
                              bs_ref, bg_ref, o_ref, *, exp_scale, k_curv):
    """add_time(merged heads) -> out_proj LorentzLinear(normalize=True) ->
    residual add on space components (time recomputed later)."""
    a_b = a_ref[...]                                        # (R, D) bf16 merged head space
    a_f = a_b.astype(jnp.float32)
    a_t = jnp.sqrt(k_curv + jnp.sum(a_f * a_f, axis=-1, keepdims=True))

    ys = (jnp.dot(a_b, wss_ref[...], preferred_element_type=jnp.float32)
          + a_t * wts_ref[...].astype(jnp.float32) + bs_ref[...])          # (R, D)
    yg = (jnp.dot(a_b, wsg_ref[...], preferred_element_type=jnp.float32)
          + a_t * wtg_ref[...].astype(jnp.float32) + bg_ref[...])          # (R, 1)
    t = jax.nn.sigmoid(yg) * exp_scale + 1.1
    sq = jnp.maximum(jnp.sum(ys * ys, axis=-1, keepdims=True), 1e-8)
    factor = jnp.sqrt(t * t - k_curv) * lax.rsqrt(sq)

    o_ref[...] = ys * factor + xs_ref[...]


def _hyp_mlp_kernel(hs_ref, w1ts_ref, w1ss_ref, b1_ref, w2ts_ref, w2ss_ref, b2_ref,
                    ot_ref, os_ref, *, k_curv):
    """add_time -> fc1 -> lorentz_activation(quick_gelu) -> fc2 -> add_time.
    (fc1/fc2 have normalize=False: their time output column is discarded.)"""
    s = hs_ref[...]                                         # (R, D) f32
    t = jnp.sqrt(k_curv + jnp.sum(s * s, axis=-1, keepdims=True))

    y1 = (jnp.dot(s.astype(jnp.bfloat16), w1ss_ref[...],
                  preferred_element_type=jnp.float32)
          + t * w1ts_ref[...].astype(jnp.float32) + b1_ref[...])           # (R, I)
    a1 = y1 * jax.nn.sigmoid(1.702 * y1)                    # quick_gelu on space part
    ht = jnp.sqrt(k_curv + jnp.sum(a1 * a1, axis=-1, keepdims=True))

    y2 = (jnp.dot(a1.astype(jnp.bfloat16), w2ss_ref[...],
                  preferred_element_type=jnp.float32)
          + ht * w2ts_ref[...].astype(jnp.float32) + b2_ref[...])          # (R, D)

    ot_ref[...] = jnp.sqrt(k_curv + jnp.sum(y2 * y2, axis=-1, keepdims=True))
    os_ref[...] = y2


# ----------------------------- wrappers ---------------------------------------

def _row_grid(n):
    cfg = _hw_config()
    r = min(cfg["block_rows"], n)
    return r, (pl.cdiv(n, r),), cfg["vmem_limit"]


def fused_qkv_proj(x_time, x_space, w_ts, w_ss, w_tg, w_sg, b_s, b_g):
    n, d = x_space.shape
    r, grid, vmem = _row_grid(n)
    kern = functools.partial(_fused_qkv_kernel, d=d,
                             exp_scale=LL_EXP_SCALE, k_curv=K_CURV)
    return pl.pallas_call(
        kern,
        out_shape=(jax.ShapeDtypeStruct((n, d), jnp.bfloat16),) * 3,
        grid=grid,
        in_specs=[
            pl.BlockSpec((r, 1), lambda i: (i, 0)),
            pl.BlockSpec((r, d), lambda i: (i, 0)),
            pl.BlockSpec((1, 3 * d), lambda i: (0, 0)),
            pl.BlockSpec((d, 3 * d), lambda i: (0, 0)),
            pl.BlockSpec((1, 3), lambda i: (0, 0)),
            pl.BlockSpec((d, 3), lambda i: (0, 0)),
            pl.BlockSpec((1, 3 * d), lambda i: (0, 0)),
            pl.BlockSpec((1, 3), lambda i: (0, 0)),
        ],
        out_specs=tuple(pl.BlockSpec((r, d), lambda i: (i, 0)) for _ in range(3)),
        compiler_params=pltpu.CompilerParams(
            dimension_semantics=("parallel",), vmem_limit_bytes=vmem),
    )(x_time, x_space, w_ts, w_ss, w_tg, w_sg, b_s, b_g)


def hyp_attention(q_space, k_space, v_space, attention_mask, *, num_heads, scale):
    b, t, d = q_space.shape
    hd = d // num_heads
    g = _head_group(num_heads, hd)          # heads per grid step
    gw = g * hd                             # lane width of a head-group block
    n_groups = num_heads // g
    vmem = _hw_config()["vmem_limit"]
    kern = functools.partial(_hyp_attention_kernel, heads_in_block=g, head_dim=hd,
                             scale=scale, k_curv=K_CURV)
    return pl.pallas_call(
        kern,
        out_shape=jax.ShapeDtypeStruct((b, t, d), jnp.bfloat16),
        grid=(b, n_groups),
        in_specs=[
            pl.BlockSpec((1, t, gw), lambda bi, gi: (bi, 0, gi)),
            pl.BlockSpec((1, t, gw), lambda bi, gi: (bi, 0, gi)),
            pl.BlockSpec((1, t, gw), lambda bi, gi: (bi, 0, gi)),
            pl.BlockSpec((1, 1, t, t), lambda bi, gi: (bi, 0, 0, 0)),   # (B,1,T,T) mask
        ],
        out_specs=pl.BlockSpec((1, t, gw), lambda bi, gi: (bi, 0, gi)),
        compiler_params=pltpu.CompilerParams(
            dimension_semantics=("parallel", "parallel"), vmem_limit_bytes=vmem),
    )(q_space, k_space, v_space, attention_mask)


def out_proj_residual(attn_space, x_space, w_ts, w_ss, w_tg, w_sg, b_s, b_g):
    n, d = x_space.shape
    r, grid, vmem = _row_grid(n)
    kern = functools.partial(_out_proj_residual_kernel,
                             exp_scale=LL_EXP_SCALE, k_curv=K_CURV)
    return pl.pallas_call(
        kern,
        out_shape=jax.ShapeDtypeStruct((n, d), jnp.float32),
        grid=grid,
        in_specs=[
            pl.BlockSpec((r, d), lambda i: (i, 0)),
            pl.BlockSpec((r, d), lambda i: (i, 0)),
            pl.BlockSpec((1, d), lambda i: (0, 0)),
            pl.BlockSpec((d, d), lambda i: (0, 0)),
            pl.BlockSpec((1, 1), lambda i: (0, 0)),
            pl.BlockSpec((d, 1), lambda i: (0, 0)),
            pl.BlockSpec((1, d), lambda i: (0, 0)),
            pl.BlockSpec((1, 1), lambda i: (0, 0)),
        ],
        out_specs=pl.BlockSpec((r, d), lambda i: (i, 0)),
        compiler_params=pltpu.CompilerParams(
            dimension_semantics=("parallel",), vmem_limit_bytes=vmem),
    )(attn_space, x_space, w_ts, w_ss, w_tg, w_sg, b_s, b_g)


def hyp_mlp(hs_space, w1_ts, w1_ss, b1_s, w2_ts, w2_ss, b2_s):
    n, d = hs_space.shape
    i1 = w1_ss.shape[1]
    r, grid, vmem = _row_grid(n)
    kern = functools.partial(_hyp_mlp_kernel, k_curv=K_CURV)
    # TODO(synk): for very large intermediate dims on 64-MiB-VMEM chips a
    #             reduction grid axis over I would cap weight residency further.
    return pl.pallas_call(
        kern,
        out_shape=(jax.ShapeDtypeStruct((n, 1), jnp.float32),
                   jax.ShapeDtypeStruct((n, d), jnp.float32)),
        grid=grid,
        in_specs=[
            pl.BlockSpec((r, d), lambda i: (i, 0)),
            pl.BlockSpec((1, i1), lambda i: (0, 0)),
            pl.BlockSpec((d, i1), lambda i: (0, 0)),
            pl.BlockSpec((1, i1), lambda i: (0, 0)),
            pl.BlockSpec((1, d), lambda i: (0, 0)),
            pl.BlockSpec((i1, d), lambda i: (0, 0)),
            pl.BlockSpec((1, d), lambda i: (0, 0)),
        ],
        out_specs=(pl.BlockSpec((r, 1), lambda i: (i, 0)),
                   pl.BlockSpec((r, d), lambda i: (i, 0))),
        compiler_params=pltpu.CompilerParams(
            dimension_semantics=("parallel",), vmem_limit_bytes=vmem),
    )(hs_space, w1_ts, w1_ss, b1_s, w2_ts, w2_ss, b2_s)


# ----------------------------- parameter prep --------------------------------

def _split_lorentz_linear(w, b):
    """(Din+1, Dout+1) LorentzLinear weight -> lane-dense bf16 pieces + f32 biases."""
    return (w[0:1, 1:].astype(jnp.bfloat16),    # time row   -> space cols
            w[1:, 1:].astype(jnp.bfloat16),     # space rows -> space cols
            w[0:1, 0:1].astype(jnp.bfloat16),   # time row   -> gate col
            w[1:, 0:1].astype(jnp.bfloat16),    # space rows -> gate col
            b[:, 1:].astype(jnp.float32),       # space bias
            b[:, 0:1].astype(jnp.float32))      # gate bias


def prepare_params(params):
    """One-time repack of raw LorentzLinear weights (concat/split/bf16-cast) so the
    per-forward pass does no weight plumbing in XLA."""
    wq, wk, wv, wo = params["wq"], params["wk"], params["wv"], params["wo"]
    bq, bk, bv, bo = params["bq"], params["bk"], params["bv"], params["bo"]
    pp = {"num_heads": int(params["num_heads"])}
    pp["qkv_w_ts"] = jnp.concatenate([w[0:1, 1:] for w in (wq, wk, wv)], 1).astype(jnp.bfloat16)
    pp["qkv_w_ss"] = jnp.concatenate([w[1:, 1:] for w in (wq, wk, wv)], 1).astype(jnp.bfloat16)
    pp["qkv_w_tg"] = jnp.concatenate([w[0:1, 0:1] for w in (wq, wk, wv)], 1).astype(jnp.bfloat16)
    pp["qkv_w_sg"] = jnp.concatenate([w[1:, 0:1] for w in (wq, wk, wv)], 1).astype(jnp.bfloat16)
    pp["qkv_b_s"] = jnp.concatenate([b[:, 1:] for b in (bq, bk, bv)], 1).astype(jnp.float32)
    pp["qkv_b_g"] = jnp.concatenate([b[:, 0:1] for b in (bq, bk, bv)], 1).astype(jnp.float32)
    (pp["wo_ts"], pp["wo_ss"], pp["wo_tg"], pp["wo_sg"],
     pp["bo_s"], pp["bo_g"]) = _split_lorentz_linear(wo, bo)
    pp["w1_ts"] = params["w1"][0:1, 1:].astype(jnp.bfloat16)
    pp["w1_ss"] = params["w1"][1:, 1:].astype(jnp.bfloat16)
    pp["b1_s"] = params["b1"][:, 1:].astype(jnp.float32)
    pp["w2_ts"] = params["w2"][0:1, 1:].astype(jnp.bfloat16)
    pp["w2_ss"] = params["w2"][1:, 1:].astype(jnp.bfloat16)
    pp["b2_s"] = params["b2"][:, 1:].astype(jnp.float32)
    return pp


# ----------------------------- encoder layer ----------------------------------

def hyp_clip_encoder_layer_split(pp, x_time, x_space, attention_mask):
    """Split-representation forward: x_time (B,T,1), x_space (B,T,D) f32,
    attention_mask (B,1,T,T) additive.  Returns (out_time, out_space)."""
    B, T, D = x_space.shape
    H = pp["num_heads"]
    hd = D // H
    scale = hd ** (-0.5)
    N = B * T

    xt = x_time.reshape(N, 1)
    xs = x_space.reshape(N, D)
    mask = attention_mask.astype(jnp.float32)

    # fused q/k/v LorentzLinear (normalize=True)  -> bf16 space tensors
    q_sp, k_sp, v_sp = fused_qkv_proj(
        xt, xs, pp["qkv_w_ts"], pp["qkv_w_ss"], pp["qkv_w_tg"],
        pp["qkv_w_sg"], pp["qkv_b_s"], pp["qkv_b_g"])

    # attention: per-head add_time + Lorentz scores + centroid, gridded (B, head-group)
    attn_space = hyp_attention(q_sp.reshape(B, T, D), k_sp.reshape(B, T, D),
                               v_sp.reshape(B, T, D), mask,
                               num_heads=H, scale=scale)              # (B,T,D) bf16
    attn_space = attn_space.reshape(N, D)

    # out_proj (normalize=True) + residual (space add)
    hs_space = out_proj_residual(attn_space, xs, pp["wo_ts"], pp["wo_ss"],
                                 pp["wo_tg"], pp["wo_sg"], pp["bo_s"], pp["bo_g"])

    # MLP: fc1 -> quick_gelu lorentz_activation -> fc2 -> add_time
    out_time, out_space = hyp_mlp(hs_space, pp["w1_ts"], pp["w1_ss"], pp["b1_s"],
                                  pp["w2_ts"], pp["w2_ss"], pp["b2_s"])
    return out_time.reshape(B, T, 1), out_space.reshape(B, T, D)


def hyp_clip_encoder_layer(pp, hidden_states, attention_mask):
    """hidden_states: (B, T, hidden+1) on the Lorentz manifold (time first)."""
    out_t, out_s = hyp_clip_encoder_layer_split(
        pp, hidden_states[..., 0:1], hidden_states[..., 1:], attention_mask)
    return jnp.concatenate([out_t, out_s], axis=-1)


# ----------------------------- demo --------------------------------------------

def init_params(key, hidden, heads, intermediate):
    D1, I1 = hidden + 1, intermediate + 1
    ks = jax.random.split(key, 6)
    std = 0.02
    return {
        "num_heads": heads,
        "wq": std * jax.random.normal(ks[0], (D1, D1), jnp.float32),
        "wk": std * jax.random.normal(ks[1], (D1, D1), jnp.float32),
        "wv": std * jax.random.normal(ks[2], (D1, D1), jnp.float32),
        "wo": std * jax.random.normal(ks[3], (D1, D1), jnp.float32),
        "w1": std * jax.random.normal(ks[4], (D1, I1), jnp.float32),
        "w2": std * jax.random.normal(ks[5], (I1, D1), jnp.float32),
        "bq": jnp.zeros((1, D1), jnp.float32),
        "bk": jnp.zeros((1, D1), jnp.float32),
        "bv": jnp.zeros((1, D1), jnp.float32),
        "bo": jnp.zeros((1, D1), jnp.float32),
        "b1": jnp.zeros((1, I1), jnp.float32),
        "b2": jnp.zeros((1, D1), jnp.float32),
    }


if __name__ == "__main__":
    B, T, HIDDEN, HEADS, INTER = 2, 8, 32, 4, 64

    root = jax.random.PRNGKey(0)
    k_params, k_x = jax.random.split(root)
    raw_params = init_params(k_params, HIDDEN, HEADS, INTER)
    params = prepare_params(raw_params)          # one-time weight repack

    # input on the Lorentz manifold (k = 1)
    space = 0.5 * jax.random.normal(k_x, (B, T, HIDDEN), jnp.float32)
    time = jnp.sqrt(K_CURV + jnp.sum(space * space, axis=-1, keepdims=True))
    hidden_states = jnp.concatenate([time, space], axis=-1)          # (B, T, 33)

    attention_mask = jnp.zeros((B, 1, T, T), jnp.float32)            # additive mask

    out = hyp_clip_encoder_layer(params, hidden_states, attention_mask)
    out = jax.block_until_ready(out)

    assert out.shape == (B, T, HIDDEN + 1), out.shape
    assert bool(jnp.all(jnp.isfinite(out)))
    # sanity: output stays on the manifold:  -t^2 + ||s||^2 == -k
    lin = -out[..., 0] ** 2 + jnp.sum(out[..., 1:] ** 2, axis=-1)
    assert bool(jnp.all(jnp.abs(lin + K_CURV) < 1e-2)), lin
    print("KERNEL_OK")
</pallas_src>

<mosaic_0001>
module attributes {stable_mosaic.version = 11 : i64} {
  func.func @_fused_qkv_kernel(%arg0: i32, %arg1: memref<16x1xf32, #tpu.memory_space<vmem>>, %arg2: memref<16x32xf32, #tpu.memory_space<vmem>>, %arg3: memref<1x96xbf16, #tpu.memory_space<vmem>>, %arg4: memref<32x96xbf16, #tpu.memory_space<vmem>>, %arg5: memref<1x3xbf16, #tpu.memory_space<vmem>>, %arg6: memref<32x3xbf16, #tpu.memory_space<vmem>>, %arg7: memref<1x96xf32, #tpu.memory_space<vmem>>, %arg8: memref<1x3xf32, #tpu.memory_space<vmem>>, %arg9: memref<16x32xbf16, #tpu.memory_space<vmem>>, %arg10: memref<16x32xbf16, #tpu.memory_space<vmem>>, %arg11: memref<16x32xbf16, #tpu.memory_space<vmem>>) attributes {dimension_semantics = [#tpu.dimension_semantics<parallel>], iteration_bounds = array<i64: 1>, scalar_prefetch = 0 : i64, scratch_operands = 0 : i64, tpu.core_type = #tpu.core_type<tc>, window_params = [{transform_indices = @transform_0, window_bounds = array<i64: 16, 1>}, {transform_indices = @transform_1, window_bounds = array<i64: 16, 32>}, {pipeline_mode = #tpu.pipeline_mode<synchronous>, transform_indices = @transform_2, window_bounds = array<i64: 1, 96>}, {pipeline_mode = #tpu.pipeline_mode<synchronous>, transform_indices = @transform_3, window_bounds = array<i64: 32, 96>}, {pipeline_mode = #tpu.pipeline_mode<synchronous>, transform_indices = @transform_4, window_bounds = array<i64: 1, 3>}, {pipeline_mode = #tpu.pipeline_mode<synchronous>, transform_indices = @transform_5, window_bounds = array<i64: 32, 3>}, {pipeline_mode = #tpu.pipeline_mode<synchronous>, transform_indices = @transform_6, window_bounds = array<i64: 1, 96>}, {pipeline_mode = #tpu.pipeline_mode<synchronous>, transform_indices = @transform_7, window_bounds = array<i64: 1, 3>}, {transform_indices = @transform_8, window_bounds = array<i64: 16, 32>}, {transform_indices = @transform_9, window_bounds = array<i64: 16, 32>}, {transform_indices = @transform_10, window_bounds = array<i64: 16, 32>}]} {
    %c0 = arith.constant 0 : index
    %c0_0 = arith.constant 0 : index
    %0 = vector.load %arg1[%c0, %c0_0] : memref<16x1xf32, #tpu.memory_space<vmem>>, vector<16x1xf32>
    %c0_1 = arith.constant 0 : index
    %c0_2 = arith.constant 0 : index
    %1 = vector.load %arg2[%c0_1, %c0_2] : memref<16x32xf32, #tpu.memory_space<vmem>>, vector<16x32xf32>
    %2 = arith.truncf %1 : vector<16x32xf32> to vector<16x32xbf16>
    %c0_3 = arith.constant 0 : index
    %c0_4 = arith.constant 0 : index
    %3 = vector.load %arg4[%c0_3, %c0_4] : memref<32x96xbf16, #tpu.memory_space<vmem>>, vector<32x96xbf16>
    %cst = arith.constant dense<0.000000e+00> : vector<16x96xf32>
    %4 = tpu.matmul %2, %3, %cst {dimension_numbers = #tpu.dot_dimension_numbers<[1], [0], [0], [1], [0, 0, 1, 1], [], []>} : vector<16x32xbf16>, vector<32x96xbf16>, vector<16x96xf32> -> vector<16x96xf32>
    %c0_5 = arith.constant 0 : index
    %c0_6 = arith.constant 0 : index
    %5 = vector.load %arg3[%c0_5, %c0_6] : memref<1x96xbf16, #tpu.memory_space<vmem>>, vector<1x96xbf16>
    %6 = arith.extf %5 : vector<1x96xbf16> to vector<1x96xf32>
    %7 = vector.broadcast %0 : vector<16x1xf32> to vector<16x96xf32>
    %8 = vector.broadcast %6 : vector<1x96xf32> to vector<16x96xf32>
    %9 = arith.mulf %7, %8 : vector<16x96xf32>
    %10 = arith.addf %4, %9 : vector<16x96xf32>
    %c0_7 = arith.constant 0 : index
    %c0_8 = arith.constant 0 : index
    %11 = vector.load %arg7[%c0_7, %c0_8] : memref<1x96xf32, #tpu.memory_space<vmem>>, vector<1x96xf32>
    %12 = vector.broadcast %11 : vector<1x96xf32> to vector<16x96xf32>
    %13 = arith.addf %10, %12 : vector<16x96xf32>
    %c0_9 = arith.constant 0 : index
    %c0_10 = arith.constant 0 : index
    %14 = vector.load %arg6[%c0_9, %c0_10] : memref<32x3xbf16, #tpu.memory_space<vmem>>, vector<32x3xbf16>
    %cst_11 = arith.constant dense<0.000000e+00> : vector<16x3xf32>
    %15 = tpu.matmul %2, %14, %cst_11 {dimension_numbers = #tpu.dot_dimension_numbers<[1], [0], [0], [1], [0, 0, 1, 1], [], []>} : vector<16x32xbf16>, vector<32x3xbf16>, vector<16x3xf32> -> vector<16x3xf32>
    %c0_12 = arith.constant 0 : index
    %c0_13 = arith.constant 0 : index
    %16 = vector.load %arg5[%c0_12, %c0_13] : memref<1x3xbf16, #tpu.memory_space<vmem>>, vector<1x3xbf16>
    %17 = arith.extf %16 : vector<1x3xbf16> to vector<1x3xf32>
    %18 = vector.broadcast %0 : vector<16x1xf32> to vector<16x3xf32>
    %19 = vector.broadcast %17 : vector<1x3xf32> to vector<16x3xf32>
    %20 = arith.mulf %18, %19 : vector<16x3xf32>
    %21 = arith.addf %15, %20 : vector<16x3xf32>
    %c0_14 = arith.constant 0 : index
    %c0_15 = arith.constant 0 : index
    %22 = vector.load %arg8[%c0_14, %c0_15] : memref<1x3xf32, #tpu.memory_space<vmem>>, vector<1x3xf32>
    %23 = vector.broadcast %22 : vector<1x3xf32> to vector<16x3xf32>
    %24 = arith.addf %21, %23 : vector<16x3xf32>
    %25 = arith.negf %24 : vector<16x3xf32>
    %26 = math.exp %25 : vector<16x3xf32>
    %cst_16 = arith.constant 1.000000e+00 : f32
    %27 = vector.broadcast %cst_16 : f32 to vector<16x3xf32>
    %28 = arith.addf %27, %26 : vector<16x3xf32>
    %29 = arith.divf %27, %28 : vector<16x3xf32>
    %cst_17 = arith.constant 1.000000e+01 : f32
    %30 = vector.broadcast %cst_17 : f32 to vector<16x3xf32>
    %31 = arith.mulf %29, %30 : vector<16x3xf32>
    %cst_18 = arith.constant 1.100000e+00 : f32
    %32 = vector.broadcast %cst_18 : f32 to vector<16x3xf32>
    %33 = arith.addf %31, %32 : vector<16x3xf32>
    %34 = vector.extract_strided_slice %13 {offsets = [0, 0], sizes = [16, 32], strides = [1, 1]} : vector<16x96xf32> to vector<16x32xf32>
    %35 = vector.extract_strided_slice %33 {offsets = [0, 0], sizes = [16, 1], strides = [1, 1]} : vector<16x3xf32> to vector<16x1xf32>
    %36 = arith.mulf %34, %34 : vector<16x32xf32>
    %cst_19 = arith.constant dense<0.000000e+00> : vector<16xf32>
    %37 = vector.multi_reduction <add>, %36, %cst_19 [1] : vector<16x32xf32> to vector<16xf32>
    %38 = vector.shape_cast %37 : vector<16xf32> to vector<16x1xf32>
    %cst_20 = arith.constant 9.99999993E-9 : f32
    %39 = vector.broadcast %cst_20 : f32 to vector<16x1xf32>
    %40 = arith.maximumf %38, %39 : vector<16x1xf32>
    %41 = arith.mulf %35, %35 : vector<16x1xf32>
    %cst_21 = arith.constant 1.000000e+00 : f32
    %42 = vector.broadcast %cst_21 : f32 to vector<16x1xf32>
    %43 = arith.subf %41, %42 : vector<16x1xf32>
    %44 = math.sqrt %43 : vector<16x1xf32>
    %45 = math.rsqrt %40 : vector<16x1xf32>
    %46 = arith.mulf %44, %45 : vector<16x1xf32>
    %47 = vector.broadcast %46 : vector<16x1xf32> to vector<16x32xf32>
    %48 = arith.mulf %34, %47 : vector<16x32xf32>
    %49 = arith.truncf %48 : vector<16x32xf32> to vector<16x32xbf16>
    %c0_22 = arith.constant 0 : index
    %c0_23 = arith.constant 0 : index
    %50 = vector.load %arg9[%c0_22, %c0_23] : memref<16x32xbf16, #tpu.memory_space<vmem>>, vector<16x32xbf16>
    tpu.vector_store %arg9[%c0_22, %c0_23], %49 {strides = array<i32>} : memref<16x32xbf16, #tpu.memory_space<vmem>>, vector<16x32xbf16>,
    %51 = vector.extract_strided_slice %13 {offsets = [0, 32], sizes = [16, 32], strides = [1, 1]} : vector<16x96xf32> to vector<16x32xf32>
    %52 = vector.extract_strided_slice %33 {offsets = [0, 1], sizes = [16, 1], strides = [1, 1]} : vector<16x3xf32> to vector<16x1xf32>
    %53 = arith.mulf %51, %51 : vector<16x32xf32>
    %cst_24 = arith.constant dense<0.000000e+00> : vector<16xf32>
    %54 = vector.multi_reduction <add>, %53, %cst_24 [1] : vector<16x32xf32> to vector<16xf32>
    %55 = vector.shape_cast %54 : vector<16xf32> to vector<16x1xf32>
    %cst_25 = arith.constant 9.99999993E-9 : f32
    %56 = vector.broadcast %cst_25 : f32 to vector<16x1xf32>
    %57 = arith.maximumf %55, %56 : vector<16x1xf32>
    %58 = arith.mulf %52, %52 : vector<16x1xf32>
    %cst_26 = arith.constant 1.000000e+00 : f32
    %59 = vector.broadcast %cst_26 : f32 to vector<16x1xf32>
    %60 = arith.subf %58, %59 : vector<16x1xf32>
    %61 = math.sqrt %60 : vector<16x1xf32>
    %62 = math.rsqrt %57 : vector<16x1xf32>
    %63 = arith.mulf %61, %62 : vector<16x1xf32>
    %64 = vector.broadcast %63 : vector<16x1xf32> to vector<16x32xf32>
    %65 = arith.mulf %51, %64 : vector<16x32xf32>
    %66 = arith.truncf %65 : vector<16x32xf32> to vector<16x32xbf16>
    %c0_27 = arith.constant 0 : index
    %c0_28 = arith.constant 0 : index
    %67 = vector.load %arg10[%c0_27, %c0_28] : memref<16x32xbf16, #tpu.memory_space<vmem>>, vector<16x32xbf16>
    tpu.vector_store %arg10[%c0_27, %c0_28], %66 {strides = array<i32>} : memref<16x32xbf16, #tpu.memory_space<vmem>>, vector<16x32xbf16>,
    %68 = vector.extract_strided_slice %13 {offsets = [0, 64], sizes = [16, 32], strides = [1, 1]} : vector<16x96xf32> to vector<16x32xf32>
    %69 = vector.extract_strided_slice %33 {offsets = [0, 2], sizes = [16, 1], strides = [1, 1]} : vector<16x3xf32> to vector<16x1xf32>
    %70 = arith.mulf %68, %68 : vector<16x32xf32>
    %cst_29 = arith.constant dense<0.000000e+00> : vector<16xf32>
    %71 = vector.multi_reduction <add>, %70, %cst_29 [1] : vector<16x32xf32> to vector<16xf32>
    %72 = vector.shape_cast %71 : vector<16xf32> to vector<16x1xf32>
    %cst_30 = arith.constant 9.99999993E-9 : f32
    %73 = vector.broadcast %cst_30 : f32 to vector<16x1xf32>
    %74 = arith.maximumf %72, %73 : vector<16x1xf32>
    %75 = arith.mulf %69, %69 : vector<16x1xf32>
    %cst_31 = arith.constant 1.000000e+00 : f32
    %76 = vector.broadcast %cst_31 : f32 to vector<16x1xf32>
    %77 = arith.subf %75, %76 : vector<16x1xf32>
    %78 = math.sqrt %77 : vector<16x1xf32>
    %79 = math.rsqrt %74 : vector<16x1xf32>
    %80 = arith.mulf %78, %79 : vector<16x1xf32>
    %81 = vector.broadcast %80 : vector<16x1xf32> to vector<16x32xf32>
    %82 = arith.mulf %68, %81 : vector<16x32xf32>
    %83 = arith.truncf %82 : vector<16x32xf32> to vector<16x32xbf16>
    %c0_32 = arith.constant 0 : index
    %c0_33 = arith.constant 0 : index
    %84 = vector.load %arg11[%c0_32, %c0_33] : memref<16x32xbf16, #tpu.memory_space<vmem>>, vector<16x32xbf16>
    tpu.vector_store %arg11[%c0_32, %c0_33], %83 {strides = array<i32>} : memref<16x32xbf16, #tpu.memory_space<vmem>>, vector<16x32xbf16>,
    return
  }
  func.func @transform_0(%arg0: i32) -> (i32, i32) {
    %c0_i32 = arith.constant 0 : i32
    %c0_i32_0 = arith.constant 0 : i32
    return %arg0, %c0_i32 : i32, i32
  }
  func.func @transform_1(%arg0: i32) -> (i32, i32) {
    %c0_i32 = arith.constant 0 : i32
    %c0_i32_0 = arith.constant 0 : i32
    return %arg0, %c0_i32 : i32, i32
  }
  func.func @transform_2(%arg0: i32) -> (i32, i32) {
    %c0_i32 = arith.constant 0 : i32
    %c0_i32_0 = arith.constant 0 : i32
    %c0_i32_1 = arith.constant 0 : i32
    return %c0_i32, %c0_i32_0 : i32, i32
  }
  func.func @transform_3(%arg0: i32) -> (i32, i32) {
    %c0_i32 = arith.constant 0 : i32
    %c0_i32_0 = arith.constant 0 : i32
    %c0_i32_1 = arith.constant 0 : i32
    return %c0_i32, %c0_i32_0 : i32, i32
  }
  func.func @transform_4(%arg0: i32) -> (i32, i32) {
    %c0_i32 = arith.constant 0 : i32
    %c0_i32_0 = arith.constant 0 : i32
    %c0_i32_1 = arith.constant 0 : i32
    return %c0_i32, %c0_i32_0 : i32, i32
  }
  func.func @transform_5(%arg0: i32) -> (i32, i32) {
    %c0_i32 = arith.constant 0 : i32
    %c0_i32_0 = arith.constant 0 : i32
    %c0_i32_1 = arith.constant 0 : i32
    return %c0_i32, %c0_i32_0 : i32, i32
  }
  func.func @transform_6(%arg0: i32) -> (i32, i32) {
    %c0_i32 = arith.constant 0 : i32
    %c0_i32_0 = arith.constant 0 : i32
    %c0_i32_1 = arith.constant 0 : i32
    return %c0_i32, %c0_i32_0 : i32, i32
  }
  func.func @transform_7(%arg0: i32) -> (i32, i32) {
    %c0_i32 = arith.constant 0 : i32
    %c0_i32_0 = arith.constant 0 : i32
    %c0_i32_1 = arith.constant 0 : i32
    return %c0_i32, %c0_i32_0 : i32, i32
  }
  func.func @transform_8(%arg0: i32) -> (i32, i32) {
    %c0_i32 = arith.constant 0 : i32
    %c0_i32_0 = arith.constant 0 : i32
    return %arg0, %c0_i32 : i32, i32
  }
  func.func @transform_9(%arg0: i32) -> (i32, i32) {
    %c0_i32 = arith.constant 0 : i32
    %c0_i32_0 = arith.constant 0 : i32
    return %arg0, %c0_i32 : i32, i32
  }
  func.func @transform_10(%arg0: i32) -> (i32, i32) {
    %c0_i32 = arith.constant 0 : i32
    %c0_i32_0 = arith.constant 0 : i32
    return %arg0, %c0_i32 : i32, i32
  }
}

</mosaic_0001>

<bundles_post_ra>
// kernel: tpu_custom_call.1
= control target key start
LH: loop header
LB: loop body
LE: loop exit
PB: predicated region body
PF: predicated region fallthrough
CT: control target
= control target key end

     0   :  { %16 = vsyncpa [#allocation3], 0  ;;  %s1154_s0 = inlined_call_operand.hbm [shape: f32[16,1], index: 0, kind: input, shape index: {}]   ;;  %s1155_s1 = inlined_call_operand.hbm [shape: f32[16,32], index: 1, kind: input, shape index: {}]   ;;  %s1156_s2 = inlined_call_operand.hbm [shape: bf16[1,96], index: 2, kind: input, shape index: {}]   ;;  %s1157_s3 = inlined_call_operand.hbm [shape: bf16[32,96], index: 3, kind: input, shape index: {}]   ;;  %s1158_s4 = inlined_call_operand.hbm [shape: bf16[1,3], index: 4, kind: input, shape index: {}]   ;;  %s1159_s5 = inlined_call_operand.hbm [shape: bf16[32,3], index: 5, kind: input, shape index: {}]   ;;  %s1160_s6 = inlined_call_operand.hbm [shape: f32[1,96], index: 6, kind: input, shape index: {}]   ;;  %s1161_s7 = inlined_call_operand.hbm [shape: f32[1,3], index: 7, kind: input, shape index: {}]   ;;  %s1162_s8 = inlined_call_operand.hbm [shape: bf16[16,32], index: 8, kind: output, shape index: {0}]   ;;  %s1163_s9 = inlined_call_operand.hbm [shape: bf16[16,32], index: 9, kind: output, shape index: {1}]   ;;  %s1164_s10 = inlined_call_operand.hbm [shape: bf16[16,32], index: 10, kind: output, shape index: {2}]  }
   0x1   :  { %17 = vsyncpa [#allocation6], 0 }
   0x2   :  { %18 = vsyncpa [#allocation9], 0 }
   0x3   :  { %19 = vsyncpa [#allocation12], 0 }
   0x4   :  { %20 = vsyncpa [#allocation15], 0 }
   0x5   :  { %21 = vsyncpa [#allocation4], 0 }
   0x6   :  { %22 = vsyncpa [#allocation18], 0  ;;  %s873_s13 = smov [#allocation5]   ;;  %s874_s15 = smov [#allocation8]  }
   0x7   :  { %s40_s14 = sshll.u32 %s873_s13, 4  ;;  %s62_s16 = sshll.u32 %s874_s15, 4  ;;  %s41_s14 = int_to_ptr.vmem [resolvable:$true] %s40_s14  ;;  %s949_s16 = int_to_ptr.vmem [resolvable:$true] %s62_s16 }
   0x8   :  { %s617_s19 = scalar_lea.hbm %s1155_s1, 256 }
   0x9   :  { %p618_p0 = scmp.ne.s32.totalorder %s1155_s1, %s617_s19  ;;  %p621_p1 = scmp.lt.u32.totalorder %s617_s19, %s1155_s1 }
   0xb   :  { %p623_p2 = pnand %p621_p1, %p618_p0 }
   0xd   :  { %626 = shalt.err (!%p623_p2)
}
   0xe   :  { %s627_s24 = scalar_lea.vmem %s41_s14, 256  ;;  %p632_p4 = scmp.lt.s32.totalorder %s41_s14, %s41_s14 }
   0xf   :  { %p628_p3 = scmp.ne.s32.totalorder %s41_s14, %s627_s24  ;;  %p633_p5 = scmp.lt.s32.totalorder %s627_s24, %s627_s24 }
  0x11   :  { %p634_p6 = por %p633_p5, %p632_p4 }
  0x13   :  { %p635_p7 = pnand %p634_p6, %p628_p3 }
  0x15   :  { %638 = shalt.err (!%p635_p7)
}
  0x16   :  { %s875_s25 = smov 128   ;;  %s876_s26 = smov 8  }
  0x17   :  { %46 = dma.hbm_to_vmem [thread:$0]  %s1155_s1, 256, %s41_s14, [#allocation6], %s875_s25, %s875_s25, %s876_s26  }
  0x18   :  { %s639_s11 = scalar_lea.hbm %s1157_s3, 256 }
  0x19   :  { %p640_p8 = scmp.ne.s32.totalorder %s1157_s3, %s639_s11  ;;  %p643_p9 = scmp.lt.u32.totalorder %s639_s11, %s1157_s3 }
  0x1b   :  { %p645_p10 = pnand %p643_p9, %p640_p8 }
  0x1d   :  { %648 = shalt.err (!%p645_p10)
}
  0x1e   :  { %s649_s18 = scalar_lea.vmem %s949_s16, 256  ;;  %p654_p12 = scmp.lt.s32.totalorder %s949_s16, %s949_s16 }
  0x1f   :  { %p650_p11 = scmp.ne.s32.totalorder %s949_s16, %s649_s18  ;;  %p655_p13 = scmp.lt.s32.totalorder %s649_s18, %s649_s18 }
  0x21   :  { %p656_p0 = por %p655_p13, %p654_p12 }
  0x23   :  { %p657_p1 = pnand %p656_p0, %p650_p11 }
  0x25   :  { %660 = shalt.err (!%p657_p1)
}
  0x26   :  { %s877_s1 = smov 64   ;;  %s878_s14 = smov 4  }
  0x27   :  { %68 = dma.hbm_to_vmem [thread:$0]  %s1157_s3, 256, %s949_s16, [#allocation9], %s877_s1, %s877_s1, %s878_s14  }
  0x28   :  { %s879_s21 = smov [#allocation11]   ;;  %s880_s23 = smov [#allocation2]  }
  0x29   :  { %s84_s22 = sshll.u32 %s879_s21, 4  ;;  %s28_s24 = sshll.u32 %s880_s23, 4  ;;  %s85_s22 = int_to_ptr.vmem [resolvable:$true] %s84_s22  ;;  %s986_s24 = int_to_ptr.vmem [resolvable:$true] %s28_s24 }
  0x2a   :  { %s661_s29 = scalar_lea.hbm %s1159_s5, 256 }
  0x2b   :  { %p662_p2 = scmp.ne.s32.totalorder %s1159_s5, %s661_s29  ;;  %p665_p3 = scmp.lt.u32.totalorder %s661_s29, %s1159_s5 }
  0x2d   :  { %p667_p4 = pnand %p665_p3, %p662_p2 }
  0x2f   :  { %670 = shalt.err (!%p667_p4)
}
  0x30   :  { %s671_s3 = scalar_lea.vmem %s85_s22, 256  ;;  %p676_p6 = scmp.lt.s32.totalorder %s85_s22, %s85_s22 }
  0x31   :  { %p672_p5 = scmp.ne.s32.totalorder %s85_s22, %s671_s3  ;;  %p677_p7 = scmp.lt.s32.totalorder %s671_s3, %s671_s3 }
  0x33   :  { %p678_p8 = por %p677_p7, %p676_p6 }
  0x35   :  { %p679_p9 = pnand %p678_p8, %p672_p5 }
  0x37   :  { %682 = shalt.err (!%p679_p9)
}
  0x38   :  { %90 = dma.hbm_to_vmem [thread:$0]  %s1159_s5, 256, %s85_s22, [#allocation12], %s877_s1, %s877_s1, %s878_s14  }
  0x39   :  { %s683_s19 = scalar_lea.hbm %s1154_s0, 256 }
  0x3a   :  { %p684_p10 = scmp.ne.s32.totalorder %s1154_s0, %s683_s19  ;;  %p687_p11 = scmp.lt.u32.totalorder %s683_s19, %s1154_s0 }
  0x3c   :  { %p689_p12 = pnand %p687_p11, %p684_p10 }
  0x3e   :  { %692 = shalt.err (!%p689_p12)
}
  0x3f   :  { %s693_s28 = scalar_lea.vmem %s986_s24, 256  ;;  %p698_p0 = scmp.lt.s32.totalorder %s986_s24, %s986_s24 }
  0x40   :  { %p694_p13 = scmp.ne.s32.totalorder %s986_s24, %s693_s28  ;;  %p699_p1 = scmp.lt.s32.totalorder %s693_s28, %s693_s28 }
  0x42   :  { %p700_p2 = por %p699_p1, %p698_p0 }
  0x44   :  { %p701_p3 = pnand %p700_p2, %p694_p13 }
  0x46   :  { %704 = shalt.err (!%p701_p3)
}
  0x47   :  { %34 = dma.hbm_to_vmem [thread:$0]  %s1154_s0, 256, %s986_s24, [#allocation3], %s875_s25, %s875_s25, %s876_s26  }
  0x48   :  { %s881_s29 = smov [#allocation7]   ;;  %s882_s11 = smov [#allocation10]  }
  0x49   :  { %s53_s30 = sshll.u32 %s881_s29, 4  ;;  %s75_s12 = sshll.u32 %s882_s11, 4  ;;  %s54_s30 = int_to_ptr.vmem [resolvable:$true] %s53_s30  ;;  %s76_s12 = int_to_ptr.vmem [resolvable:$true] %s75_s12 }
  0x4a   :  { %s705_s16 = scalar_lea.hbm %s1156_s2, 16 }
  0x4b   :  { %p706_p4 = scmp.ne.s32.totalorder %s1156_s2, %s705_s16  ;;  %p709_p5 = scmp.lt.u32.totalorder %s705_s16, %s1156_s2 }
  0x4d   :  { %p711_p6 = pnand %p709_p5, %p706_p4 }
  0x4f   :  { %714 = shalt.err (!%p711_p6)
}
  0x50   :  { %s715_s0 = scalar_lea.vmem %s54_s30, 16  ;;  %s719_s25 = scalar_lea.vmem %s54_s30, 32 }
  0x51   :  { %p716_p7 = scmp.ne.s32.totalorder %s54_s30, %s715_s0  ;;  %p720_p8 = scmp.lt.s32.totalorder %s54_s30, %s54_s30 }
  0x52   :  { %p721_p9 = scmp.lt.s32.totalorder %s719_s25, %s715_s0 }
  0x54   :  { %p722_p10 = por %p721_p9, %p720_p8 }
  0x56   :  { %p723_p11 = pnand %p722_p10, %p716_p7 }
  0x58   :  { %726 = shalt.err (!%p723_p11)
}
  0x59   :  { %56 = dma.hbm_to_vmem [thread:$0]  %s1156_s2, 16, %s54_s30, [#allocation6]  }
  0x5a   :  { %s727_s23 = scalar_lea.hbm %s1158_s4, 16 }
  0x5b   :  { %p728_p12 = scmp.ne.s32.totalorder %s1158_s4, %s727_s23  ;;  %p731_p13 = scmp.lt.u32.totalorder %s727_s23, %s1158_s4 }
  0x5d   :  { %p733_p0 = pnand %p731_p13, %p728_p12 }
  0x5f   :  { %736 = shalt.err (!%p733_p0)
}
  0x60   :  { %s737_s29 = scalar_lea.vmem %s76_s12, 16  ;;  %s741_s11 = scalar_lea.vmem %s76_s12, 32 }
  0x61   :  { %p738_p1 = scmp.ne.s32.totalorder %s76_s12, %s737_s29  ;;  %p742_p2 = scmp.lt.s32.totalorder %s76_s12, %s76_s12 }
  0x62   :  { %p743_p3 = scmp.lt.s32.totalorder %s741_s11, %s737_s29 }
  0x64   :  { %p744_p4 = por %p743_p3, %p742_p2 }
  0x66   :  { %p745_p5 = pnand %p744_p4, %p738_p1 }
  0x68   :  { %748 = shalt.err (!%p745_p5)
}
  0x69   :  { %78 = dma.hbm_to_vmem [thread:$0]  %s1158_s4, 16, %s76_s12, [#allocation9]  }
  0x6a   :  { %s883_s13 = smov [#allocation13]   ;;  %s884_s16 = smov [#allocation14]  }
  0x6b   :  { %s97_s3 = sshll.u32 %s883_s13, 4  ;;  %s107_s15 = sshll.u32 %s884_s16, 4  ;;  %s98_s3 = int_to_ptr.vmem [resolvable:$true] %s97_s3  ;;  %s108_s15 = int_to_ptr.vmem [resolvable:$true] %s107_s15 }
  0x6c   :  { %s749_s19 = scalar_lea.hbm %s1160_s6, 16 }
  0x6d   :  { %p750_p6 = scmp.ne.s32.totalorder %s1160_s6, %s749_s19  ;;  %p753_p7 = scmp.lt.u32.totalorder %s749_s19, %s1160_s6 }
  0x6f   :  { %p755_p8 = pnand %p753_p7, %p750_p6 }
  0x71   :  { %758 = shalt.err (!%p755_p8)
}
  0x72   :  { %s759_s4 = scalar_lea.vmem %s98_s3, 16  ;;  %s763_s12 = scalar_lea.vmem %s98_s3, 32 }
  0x73   :  { %p760_p9 = scmp.ne.s32.totalorder %s98_s3, %s759_s4  ;;  %p764_p10 = scmp.lt.s32.totalorder %s98_s3, %s98_s3 }
  0x74   :  { %p765_p11 = scmp.lt.s32.totalorder %s763_s12, %s759_s4 }
  0x76   :  { %p766_p12 = por %p765_p11, %p764_p10 }
  0x78   :  { %p767_p13 = pnand %p766_p12, %p760_p9 }
  0x7a   :  { %770 = shalt.err (!%p767_p13)
}
  0x7b   :  { %100 = dma.hbm_to_vmem [thread:$0]  %s1160_s6, 16, %s98_s3, [#allocation12]  }
  0x7c   :  { %s771_s28 = scalar_lea.hbm %s1161_s7, 16 }
  0x7d   :  { %p772_p0 = scmp.ne.s32.totalorder %s1161_s7, %s771_s28  ;;  %p775_p1 = scmp.lt.u32.totalorder %s771_s28, %s1161_s7 }
  0x7f   :  { %p777_p2 = pnand %p775_p1, %p772_p0 }
  0x81   :  { %780 = shalt.err (!%p777_p2)
}
  0x82   :  { %s781_s2 = scalar_lea.vmem %s108_s15, 16  ;;  %s785_s30 = scalar_lea.vmem %s108_s15, 32 }
  0x83   :  { %p782_p3 = scmp.ne.s32.totalorder %s108_s15, %s781_s2  ;;  %p786_p4 = scmp.lt.s32.totalorder %s108_s15, %s108_s15 }
  0x84   :  { %p787_p5 = scmp.lt.s32.totalorder %s785_s30, %s781_s2 }
  0x86   :  { %p788_p6 = por %p787_p5, %p786_p4 }
  0x88   :  { %p789_p7 = pnand %p788_p6, %p782_p3 }
  0x8a   :  { %792 = shalt.err (!%p789_p7)
}
  0x8b   :  { %110 = dma.hbm_to_vmem [thread:$0]  %s1161_s7, 16, %s108_s15, [#allocation15]  }
  0x8c   :  { %859 = dma.done.wait [#allocation3], 256  }
  0x8d   :  { %860 = vsyncadd [#allocation3], 4294967040 }
  0x8e   :  { %861 = dma.done.wait [#allocation6], 272  }
  0x8f   :  { %862 = vsyncadd [#allocation6], 4294967024 }
  0x90   :  { %863 = dma.done.wait [#allocation9], 272  }
  0x91   :  { %864 = vsyncadd [#allocation9], 4294967024 }
  0x92   :  { %865 = dma.done.wait [#allocation12], 272  }
  0x93   :  { %866 = vsyncadd [#allocation12], 4294967024 }
  0x94   :  { %867 = dma.done.wait [#allocation15], 16  }
  0x95   :  { %868 = vsyncadd [#allocation15], 4294967280  ;;  %v885_v0 = vmov 0.0   ;;  %vm886_vm0 = vmmov 0   ;;  %v887_v1 = vmov 0   ;;  %v589_v2 = vld [vmem:[#allocation8] sm:$0xff]   ;;  %v157_v11 = vlaneseq }
  0x96   :  { %546 = vmatprep.subr.bf16.mxu0 %v885_v0  ;;  %554 = vmatprep.subr.bf16.mxu1 %v885_v0  ;;  %v590_v3 = vld [vmem:[#allocation11] sm:$0xff]   ;;  %v591_v4 = vld [vmem:[#allocation8 + $0x8] sm:$0xff]   ;;  %v592_v5 = vld [vmem:[#allocation11 + $0x8] sm:$0xff]   ;;  %vm175_vm1 = vcmask 261120   ;;  %s888_s7 = smov 96   ;;  %v889_v53 = vmov 1  }
  0x97   :  { %550 = vmatprep.mubr.msk.bf16.mxu0 %vm886_vm0, %v885_v0  ;;  %558 = vmatprep.mubr.msk.bf16.mxu1 %vm886_vm0, %v885_v0  ;;  %v138_v6 = vld [vmem:[#allocation5] sm:$0xff]  ;;  %v139_v7 = vld [vmem:[#allocation5 + $0x8] sm:$0xff]  ;;  %v136_v8 = vld [vmem:[#allocation2] sm:$0xff]  ;;  %v158_v12 = vshrl.u32 %v157_v11, 7  ;;  %vm371_vm6 = vcmask 257024   ;;  %s891_s3 = smov [#allocation16]  }
  0x98   :  { %583 = vset.pattern.permute.xlu0 %v887_v1  ;;  %547 = vmatpush3.bf16.msra.mxu0 %v589_v2  ;;  %v140_v9 = vpack.c.bf16 %v139_v7, %v138_v6  ;;  %v137_v10 = vld [vmem:[#allocation2 + $0x8] sm:$0xff]  ;;  %v233_v13 = vld [vmem:[#allocation10] sm:$0x1]  ;;  %v145_v19 = vld [vmem:[#allocation7] sm:$0x1]  ;;  %s469_s16 = sshll.u32 %s891_s3, 4  ;;  %s470_s16 = int_to_ptr.vmem [resolvable:$true] %s469_s16 }
  0x99   :  { %555 = vmatpush3.bf16.msra.mxu1 %v590_v3  ;;  %548 = vmatprep.subr.bf16.mxu0 %v885_v0  ;;  %v159_v14 = vsub.s32 0, %v158_v12  ;;  %v234_v15 = vunpack.c.l.bf16 %v233_v13  ;;  %v146_v20 = vunpack.c.l.bf16 %v145_v19  ;;  %v519_v25 = vld [vmem:[#allocation13] ss:$0 sm:$0xff]  ;;  %v523_v54 = vld [vmem:[#allocation14] ss:$0 sm:$0xff]  ;;  %s793_s15 = scalar_lea.vmem %s470_s16, 128  ;;  %p798_p9 = scmp.lt.s32.totalorder %s470_s16, %s470_s16 }
  0x9a   :  { %556 = vmatprep.subr.bf16.mxu1 %v885_v0  ;;  %149 = vperm.xlu0 %583, %v136_v8   ;;  %p794_p8 = scmp.ne.s32.totalorder %s470_s16, %s793_s15  ;;  %p799_p10 = scmp.lt.s32.totalorder %s793_s15, %s793_s15 }
  0x9b   :  { %v238_v16 = vrot.slane %v234_v15, %v159_v14  ;;  %v160_v21 = vrot.slane %v146_v20, %v159_v14  ;;  %584 = vset.pattern.permute.xlu1 %v889_v53 }
  0x9c   :  { %549 = vmatpush3.bf16.msra.mxu0 %v591_v4  ;;  %p800_p11 = por %p799_p10, %p798_p9 }
  0x9d   :  { %557 = vmatpush3.bf16.msra.mxu1 %v592_v5 }
  0x9e   :  { %154 = vperm.xlu0 %583, %v137_v10   ;;  %p801_p12 = pnand %p800_p11, %p794_p8 }
  0x9f   :  { %551 = vmatmul.mubr.msk.bf16.vlgmr.msra.gmra.mrb[0].mxu0 %vm175_vm1, %v140_v9 }
  0xa0   :  { %559 = vmatmul.mubr.msk.bf16.vlgmr.msra.gmra.mrb[0].mxu1 %vm175_vm1, %v140_v9 }
  0xa2   :  { %585 = vset.pattern.permute.xlu0 %v889_v53 }
 0x119   :  { %v150_v17 = vpop.permute.xlu0 %149 }
 0x11a   :  { %v239_v18 = vmul.f32 %v238_v16, %v150_v17  ;;  %v161_v22 = vmul.f32 %v160_v21, %v150_v17 }
 0x11d   :  { %v155_v23 = vpop.permute.xlu0 %154 }
 0x11e   :  { %v162_v26 = vmul.f32 %v160_v21, %v155_v23  ;;  %v240_v30 = vmul.f32 %v238_v16, %v155_v23 }
 0x172   :  { %v213_v24 = vpop.f32.mrb[0].mxu0 }
 0x173   :  { %v214_v27 = vadd.f32 %v213_v24, %v161_v22  ;;  %v287_v28 = vpop.f32.mrb[0].mxu1  ;;  %v552_v29 = vpop.f32.mrb[1].mxu0 }
 0x174   :  { %v288_v31 = vadd.f32 %v287_v28, %v239_v18  ;;  %v560_v32 = vpop.f32.mrb[1].mxu1  ;;  %v216_v33 = vpop.f32.mrb[2].mxu0 }
 0x175   :  { %v1074_v34 = vadd.f32 %v519_v25, %v214_v27  ;;  %v217_v35 = vadd.f32 %v216_v33, %v162_v26  ;;  %v290_v36 = vpop.f32.mrb[2].mxu1  ;;  %v553_v37 = vpop.f32.mrb[3].mxu0 }
 0x176   :  { %v291_v38 = vadd.f32 %v290_v36, %v240_v30  ;;  %v561_v39 = vpop.f32.mrb[3].mxu1  ;;  %v301_v55 = vadd.f32 %v523_v54, %v288_v31 }
 0x177   :  { %v1076_v40 = vadd.f32 %v519_v25, %v217_v35  ;;  %v319_v41 = vmul.f32 %v1074_v34, %v1074_v34  ;;  %v890_v39 = vmov 2  }
 0x178   :  { %v524_v56 = vmul.f32 -1.442695, %v301_v55  ;;  %v302_v57 = vadd.f32 %v523_v54, %v291_v38 }
 0x179   :  { %420 = vrot.lane.b32.xlu0 %v319_v41, %s877_s1  ;;  %376 = vrot.lane.b32.xlu1 %v319_v41, %s888_s7  ;;  %v320_v42 = vmul.f32 %v1076_v40, %v1076_v40  ;;  %v321_v50 = vsel %vm175_vm1, %v319_v41, 0.0 }
 0x17a   :  { %593 = vpow2.f32 %v524_v56  ;;  %v525_v58 = vmul.f32 -1.442695, %v302_v57 }
 0x17b   :  { %v324_v52 = vsel %vm175_vm1, %v320_v42, 0.0 }
 0x17c   :  { %595 = vpow2.f32 %v525_v58 }
 0x17d   :  { %378 = vrot.lane.b32.xlu1 %v320_v42, %s888_s7 }
 0x181   :  { %422 = vrot.lane.b32.xlu1 %v320_v42, %s877_s1 }
 0x184   :  { %v594_v59 = vpop.eup %593 }
 0x185   :  { %v309_v60 = vadd.f32 1.0, %v594_v59 }
 0x186   :  { %v596_v61 = vpop.eup %595 }
 0x187   :  { %597 = vrcp.f32 %v309_v60  ;;  %v310_v62 = vadd.f32 1.0, %v596_v61 }
 0x189   :  { %599 = vrcp.f32 %v310_v62 }
 0x191   :  { %v598_v63 = vpop.eup %597 }
 0x192   :  { %v315_v0 = vmul.f32 10.0, %v598_v63 }
 0x193   :  { %v600_v2 = vpop.eup %599 }
 0x194   :  { %v317_v3 = vadd.f32 1.1, %v315_v0  ;;  %v316_v4 = vmul.f32 10.0, %v600_v2 }
 0x196   :  { %v329_v5 = vmul.f32 %v317_v3, %v317_v3  ;;  %v318_v6 = vadd.f32 1.1, %v316_v4 }
 0x198   :  { %v526_v7 = vadd.f32 -1.0, %v329_v5  ;;  %v330_v8 = vmul.f32 %v318_v6, %v318_v6 }
 0x19a   :  { %v527_v9 = vadd.f32 -1.0, %v330_v8  ;;  %601 = vrsqrt.f32 %v526_v7  ;;  %vm335_vm2 = vcmp.eq.f32.partialorder %v526_v7, inf  ;;  %v338_v25 = vand.u32 2147483648, %v526_v7 }
 0x19b   :  { %vm337_vm3 = vcmp.eq.f32.partialorder %v526_v7, 0.0 }
 0x19c   :  { %603 = vrsqrt.f32 %v527_v9  ;;  %vm342_vm4 = vcmp.eq.f32.partialorder %v527_v9, inf  ;;  %v345_v32 = vand.u32 2147483648, %v527_v9  ;;  %vm344_vm5 = vcmp.eq.f32.partialorder %v527_v9, 0.0 }
 0x1a4   :  { %v602_v12 = vpop.eup %601 }
 0x1a5   :  { %v334_v17 = vmul.f32 %v602_v12, %v526_v7 }
 0x1a6   :  { %v604_v18 = vpop.eup %603 }
 0x1a7   :  { %v336_v22 = vsel %vm335_vm2, %v526_v7, %v334_v17  ;;  %v341_v23 = vmul.f32 %v604_v18, %v527_v9 }
 0x1a8   :  { %v339_v28 = vsel %vm337_vm3, %v338_v25, %v336_v22 }
 0x1a9   :  { %v343_v30 = vsel %vm342_vm4, %v527_v9, %v341_v23 }
 0x1aa   :  { %v346_v35 = vsel %vm344_vm5, %v345_v32, %v343_v30 }
 0x1eb   :  { %v377_v43 = vpop.permute.xlu1 %376  ;;  %v421_v45 = vpop.permute.xlu0 %420 }
 0x1ec   :  { %v382_v44 = vsel %vm175_vm1, %v377_v43, 0.0  ;;  %v426_v48 = vsel %vm175_vm1, %v421_v45, 0.0 }
 0x1ed   :  { %383 = vadd.xlane.f32.xlu0 %v382_v44 }
 0x1ef   :  { %v379_v46 = vpop.permute.xlu1 %378 }
 0x1f0   :  { %v385_v47 = vsel %vm175_vm1, %v379_v46, 0.0 }
 0x1f1   :  { %386 = vadd.xlane.f32.xlu1 %v385_v47  ;;  %427 = vadd.xlane.f32.xlu0 %v426_v48 }
 0x1f3   :  { %v423_v49 = vpop.permute.xlu1 %422 }
 0x1f4   :  { %v429_v51 = vsel %vm175_vm1, %v423_v49, 0.0 }
 0x1f5   :  { %322 = vadd.xlane.f32.xlu1 %v321_v50  ;;  %430 = vadd.xlane.f32.xlu0 %v429_v51 }
 0x1f9   :  { %325 = vadd.xlane.f32.xlu0 %v324_v52 }
 0x27a   :  { %v384_v10 = vpop.xlane.xlu0 %383 }
 0x27b   :  { %v388_v11 = vmax.f32 %v384_v10, 1e-08 }
 0x27d   :  { %605 = vrsqrt.f32 %v388_v11 }
 0x27e   :  { %v387_v13 = vpop.xlane.xlu1 %386  ;;  %v428_v14 = vpop.xlane.xlu0 %427 }
 0x27f   :  { %v389_v15 = vmax.f32 %v387_v13, 1e-08  ;;  %v432_v16 = vmax.f32 %v428_v14, 1e-08 }
 0x281   :  { %607 = vrsqrt.f32 %v389_v15 }
 0x282   :  { %609 = vrsqrt.f32 %v432_v16  ;;  %v323_v19 = vpop.xlane.xlu1 %322  ;;  %v431_v20 = vpop.xlane.xlu0 %430 }
 0x283   :  { %v433_v21 = vmax.f32 %v431_v20, 1e-08  ;;  %v327_v24 = vmax.f32 %v323_v19, 1e-08 }
 0x285   :  { %611 = vrsqrt.f32 %v433_v21 }
 0x286   :  { %v326_v26 = vpop.xlane.xlu0 %325  ;;  %613 = vrsqrt.f32 %v327_v24 }
 0x287   :  { %v606_v27 = vpop.eup %605  ;;  %v328_v31 = vmax.f32 %v326_v26, 1e-08 }
 0x288   :  { %v392_v29 = vmul.f32 %v606_v27, %v339_v28 }
 0x289   :  { %615 = vrsqrt.f32 %v328_v31 }
 0x28a   :  { %396 = vperm.xlu1 %584, %v392_v29  }
 0x28b   :  { %v608_v33 = vpop.eup %607 }
 0x28c   :  { %v610_v36 = vpop.eup %609  ;;  %v393_v37 = vmul.f32 %v608_v33, %v346_v35 }
 0x28d   :  { %v436_v38 = vmul.f32 %v610_v36, %v339_v28 }
 0x28e   :  { %401 = vperm.xlu0 %585, %v393_v37   ;;  %586 = vset.pattern.permute.xlu1 %v890_v39 }
 0x28f   :  { %440 = vperm.xlu1 %586, %v436_v38   ;;  %v612_v41 = vpop.eup %611 }
 0x290   :  { %v437_v42 = vmul.f32 %v612_v41, %v346_v35  ;;  %v614_v43 = vpop.eup %613 }
 0x291   :  { %v349_v44 = vmul.f32 %v614_v43, %v339_v28 }
 0x292   :  { %588 = vset.pattern.permute.xlu0 %v890_v39 }
 0x293   :  { %445 = vperm.xlu1 %586, %v437_v42   ;;  %v616_v45 = vpop.eup %615 }
 0x294   :  { %v350_v46 = vmul.f32 %v616_v45, %v346_v35 }
 0x297   :  { %587 = vset.pattern.permute.xlu1 %v887_v1 }
 0x298   :  { %353 = vperm.xlu1 %587, %v349_v44  }
 0x29c   :  { %358 = vperm.xlu1 %587, %v350_v46  }
 0x309   :  { %v397_v47 = vpop.permute.xlu1 %396 }
 0x30a   :  { %v404_v48 = vmul.f32 %v397_v47, %v1074_v34 }
 0x30c   :  { %v536_v49 = vpack.c.bf16 %v404_v48, %v404_v48 }
 0x30d   :  { %v402_v50 = vpop.permute.xlu0 %401 }
 0x30e   :  { %v441_v51 = vpop.permute.xlu1 %440  ;;  %412 = vrot.lane.b32.xlu1 %v536_v49, %s888_s7  ;;  %v405_v53 = vmul.f32 %v402_v50, %v1076_v40 }
 0x30f   :  { %v448_v52 = vmul.f32 %v441_v51, %v1074_v34 }
 0x310   :  { %v537_v1 = vpack.c.bf16 %v405_v53, %v405_v53 }
 0x311   :  { %v538_v54 = vpack.c.bf16 %v448_v52, %v448_v52 }
 0x312   :  { %v446_v55 = vpop.permute.xlu1 %445 }
 0x313   :  { %456 = vrot.lane.b32.xlu1 %v538_v54, %s877_s1  ;;  %v449_v56 = vmul.f32 %v446_v55, %v1076_v40 }
 0x315   :  { %v539_v59 = vpack.c.bf16 %v449_v56, %v449_v56 }
 0x317   :  { %v354_v57 = vpop.permute.xlu1 %353  ;;  %414 = vrot.lane.b32.xlu1 %v537_v1, %s888_s7 }
 0x318   :  { %v361_v58 = vmul.f32 %v354_v57, %v1074_v34 }
 0x31a   :  { %v534_v60 = vpack.c.bf16 %v361_v58, %v361_v58 }
 0x31b   :  { %v359_v61 = vpop.permute.xlu1 %358  ;;  %458 = vrot.lane.b32.xlu1 %v539_v59, %s877_s1 }
 0x31c   :  { %v362_v62 = vmul.f32 %v359_v61, %v1076_v40  ;;  %372 = vst.msk [vmem:[#allocation16] sm:$0xf] %vm371_vm6, %v534_v60 }
 0x31e   :  { %v535_v63 = vpack.c.bf16 %v362_v62, %v362_v62 }
 0x320   :  { %373 = vst.msk [vmem:[#allocation16 + $0x4] sm:$0xf] %vm371_vm6, %v535_v63 }
 0x321   :  { %804 = shalt.err (!%p801_p12)
}
 0x322   :  { %s805_s19 = scalar_lea.hbm %s1162_s8, 128 }
 0x323   :  { %p806_p13 = scmp.ne.s32.totalorder %s1162_s8, %s805_s19  ;;  %p809_p0 = scmp.lt.u32.totalorder %s805_s19, %s1162_s8 }
 0x325   :  { %p811_p1 = pnand %p809_p0, %p806_p13 }
 0x327   :  { %814 = shalt.err (!%p811_p1)
}
 0x328   :  { %475 = dma.vmem_to_hbm [thread:$0]  %s470_s16, 128, %s1162_s8, [#allocation4], %s877_s1, %s877_s1, %s878_s14  }
 0x329   :  { %s892_s20 = smov [#allocation17]   ;;  %s893_s23 = smov [#allocation19]  }
 0x32a   :  { %s481_s21 = sshll.u32 %s892_s20, 4  ;;  %s493_s27 = sshll.u32 %s893_s23, 4  ;;  %s482_s21 = int_to_ptr.vmem [resolvable:$true] %s481_s21  ;;  %s494_s27 = int_to_ptr.vmem [resolvable:$true] %s493_s27 }
 0x32b   :  { %s815_s28 = scalar_lea.vmem %s482_s21, 128  ;;  %p820_p3 = scmp.lt.s32.totalorder %s482_s21, %s482_s21 }
 0x32c   :  { %p816_p2 = scmp.ne.s32.totalorder %s482_s21, %s815_s28  ;;  %p821_p4 = scmp.lt.s32.totalorder %s815_s28, %s815_s28 }
 0x32e   :  { %p822_p5 = por %p821_p4, %p820_p3 }
 0x330   :  { %p823_p6 = pnand %p822_p5, %p816_p2 }
 0x380   :  { %v413_v34 = vpop.permute.xlu1 %412 }
 0x381   :  { %418 = vst.msk [vmem:[#allocation17] sm:$0xf] %vm371_vm6, %v413_v34 }
 0x385   :  { %v457_v40 = vpop.permute.xlu1 %456 }
 0x386   :  { %462 = vst.msk [vmem:[#allocation19] sm:$0xf] %vm371_vm6, %v457_v40 }
 0x389   :  { %v415_v0 = vpop.permute.xlu1 %414 }
 0x38a   :  { %419 = vst.msk [vmem:[#allocation17 + $0x4] sm:$0xf] %vm371_vm6, %v415_v0 }
 0x38b   :  { %826 = shalt.err (!%p823_p6)
}
 0x38c   :  { %s827_s22 = scalar_lea.hbm %s1163_s9, 128 }
 0x38d   :  { %p828_p7 = scmp.ne.s32.totalorder %s1163_s9, %s827_s22  ;;  %p831_p8 = scmp.lt.u32.totalorder %s827_s22, %s1163_s9 }
 0x38f   :  { %p833_p9 = pnand %p831_p8, %p828_p7 }
 0x391   :  { %836 = shalt.err (!%p833_p9)
}
 0x392   :  { %487 = dma.vmem_to_hbm [thread:$0]  %s482_s21, 128, %s1163_s9, [#allocation18], %s877_s1, %s877_s1, %s878_s14   ;;  %v459_v2 = vpop.permute.xlu1 %458 }
 0x393   :  { %463 = vst.msk [vmem:[#allocation19 + $0x4] sm:$0xf] %vm371_vm6, %v459_v2  ;;  %s837_s7 = scalar_lea.vmem %s494_s27, 128  ;;  %p842_p11 = scmp.lt.s32.totalorder %s494_s27, %s494_s27 }
 0x394   :  { %p838_p10 = scmp.ne.s32.totalorder %s494_s27, %s837_s7  ;;  %p843_p12 = scmp.lt.s32.totalorder %s837_s7, %s837_s7 }
 0x396   :  { %p844_p13 = por %p843_p12, %p842_p11 }
 0x398   :  { %p845_p0 = pnand %p844_p13, %p838_p10 }
 0x39a   :  { %848 = shalt.err (!%p845_p0)
}
 0x39b   :  { %s849_s15 = scalar_lea.hbm %s1164_s10, 128 }
 0x39c   :  { %p850_p1 = scmp.ne.s32.totalorder %s1164_s10, %s849_s15  ;;  %p853_p2 = scmp.lt.u32.totalorder %s849_s15, %s1164_s10 }
 0x39e   :  { %p855_p3 = pnand %p853_p2, %p850_p1 }
 0x3a0   :  { %858 = shalt.err (!%p855_p3)
}
 0x3a1   :  { %499 = dma.vmem_to_hbm [thread:$0]  %s494_s27, 128, %s1164_s10, [#allocation18], %s877_s1, %s877_s1, %s878_s14  }
 0x3a2   :  { %869 = dma.done.wait [#allocation4], 128  }
 0x3a3   :  { %870 = vsyncadd [#allocation4], 4294967168 }
 0x3a4   :  { %871 = dma.done.wait [#allocation18], 256  }
 0x3a5   :  { %872 = vsyncadd [#allocation18], 4294967040 }
 0x3a6   :  { %509 = vsyncpa [#allocation3], 1 }
 0x3a7   :  { %510 = vsyncpa [#allocation6], 1 }
 0x3a8   :  { %511 = vsyncpa [#allocation9], 1 }
 0x3a9   :  { %512 = vsyncpa [#allocation12], 1 }
 0x3aa   :  { %513 = vsyncpa [#allocation15], 1 }
 0x3ab   :  { %514 = vsyncpa [#allocation4], 1 }
 0x3ac   :  { %515 = vsyncpa [#allocation18], 1 }

</bundles_post_ra>
